<compile_context>
chip_gen: v7x
topology: tpu7x:2x2x1
jax: 0.10.0
libtpu: 0.0.40
codegen_flags: <defaults>
</compile_context>

<pallas_src>
import functools

import jax
import jax.numpy as jnp
import numpy as np
from jax.experimental import pallas as pl
from jax.experimental.pallas import tpu as pltpu

NUM_CLIENTS = 20
NUM_ACTIVE_HEADS = 10   # forward only uses the first 10 heads
LN_EPS = 1e-5
_MAX_LANE_UNROLL = 64   # max (THW // 128) chunks unrolled for the deferred reduce


# --------------------------------------------------------------------------
# Fused kernel: LayerNorm over channels (per spatial position) + global avg
# pool (accumulated over HW grid steps) + all-heads Linear on the last step.
#   x_ref:    (TN, C, THW)      input tile; channels on sublanes, spatial on lanes
#   w_ref:    (C, NKpad)        folded weights (gamma and 1/HW folded in, heads concat)
#   b_ref:    (1, NKpad)        folded bias    (beta@W + bias, heads concat)
#   o_ref:    (TN, 1, NKpad)    lane-dense output slab
#   acc_ref:  (TN, C, lane_acc) VMEM accumulator for sum_hw(x * rstd)
#   corr_ref: (TN, 1, lane_acc) VMEM accumulator for sum_hw(mu * rstd)
# --------------------------------------------------------------------------
def fused_ln_pool_head_kernel(x_ref, w_ref, b_ref, o_ref, acc_ref, corr_ref, *,
                              inv_c, lane_acc, defer_lane_reduce):
    j = pl.program_id(1)                                  # HW reduction axis

    @pl.when(j == 0)
    def _init():
        acc_ref[...] = jnp.zeros_like(acc_ref)
        corr_ref[...] = jnp.zeros_like(corr_ref)

    x = x_ref[...].astype(jnp.float32)                    # (TN, C, THW)
    # One-pass LayerNorm statistics over the channel (sublane) axis.
    # TODO(synk): E[x^2]-E[x]^2 can cancel for offset-heavy activations; f32
    # accumulation + eps=1e-5 keeps it accurate for normal-scale inputs.
    s = jnp.sum(x, axis=1, keepdims=True)                 # (TN, 1, THW)
    ss = jnp.sum(x * x, axis=1, keepdims=True)            # (TN, 1, THW)
    mu = s * inv_c
    var = ss * inv_c - mu * mu
    rstd = jax.lax.rsqrt(var + LN_EPS)                    # (TN, 1, THW)

    # Algebraic fold: sum_hw((x-mu)*rstd) == sum_hw(x*rstd) - sum_hw(mu*rstd),
    # so (x - mu) is never materialized on the full (TN, C, THW) tile.
    xs = x * rstd                                         # (TN, C, THW)
    ms = mu * rstd                                        # (TN, 1, THW), cheap

    thw = x_ref.shape[-1]
    if defer_lane_reduce:
        # Lane-chunked partial sums: static lane-aligned slices + pure VALU
        # vreg adds per HW step; the 128->1 XLU cross-lane reduce happens
        # exactly once, in the finalize below.
        xa = xs[:, :, 0:lane_acc]
        ma = ms[:, :, 0:lane_acc]
        for off in range(lane_acc, thw, lane_acc):
            xa = xa + xs[:, :, off:off + lane_acc]
            ma = ma + ms[:, :, off:off + lane_acc]
        acc_ref[...] += xa
        corr_ref[...] += ma
    else:
        acc_ref[...] += jnp.sum(xs, axis=2, keepdims=True)
        corr_ref[...] += jnp.sum(ms, axis=2, keepdims=True)

    @pl.when(j == pl.num_programs(1) - 1)
    def _finalize():
        pooled = (jnp.sum(acc_ref[...], axis=2)
                  - jnp.sum(corr_ref[...], axis=2))       # (TN, C); corr bcast over C
        # 1/HW is pre-folded into w_ref; beta@W + bias is pre-folded into b_ref.
        out = jnp.dot(pooled, w_ref[...],
                      preferred_element_type=jnp.float32)  # (TN, NKpad)
        o_ref[...] = (out + b_ref[...])[:, None, :]        # (TN, 1, NKpad)


def _vmem_limit_bytes():
    """Generation-aware scoped-VMEM limit: ~3/4 of physical per-core VMEM,
    capped at 100 MiB (v5e/v6e: 128 MiB -> 96 MiB; v7x: 64 MiB -> 48 MiB)."""
    cap = 128 * 1024 * 1024
    try:
        info = pltpu.get_tpu_info()
        cap = int(getattr(info, "vmem_capacity_bytes", cap))
    except Exception:
        pass
    return max(16 * 1024 * 1024, min((cap * 3) // 4, 100 * 1024 * 1024))


def _choose_tiles(n, c, hw, elem_bytes, nk_pad, vmem_limit):
    """Pick (TN, THW).

    THW is a multiple of 128 that evenly divides hw (or hw itself when hw is
    not lane-tileable).  TN is a divisor of n: TN is never one of the last two
    dims of any block spec here, so the (8,128) rule does not constrain it.
    The x tile targets ~1/4 of the scoped VMEM limit so (triple-buffered) x +
    resident W'/b' + out + scratch all fit, and when possible the N axis keeps
    >= 2 grid steps so both v7x TensorCores stream."""
    x_budget = max(vmem_limit // 4, 128 * 1024)

    if hw % 128 == 0:
        cands = [t for t in range(hw, 0, -128) if hw % t == 0]   # descending
    else:
        cands = [hw]                                             # full-extent block
    thw = cands[-1]
    for t in cands:
        if c * t * elem_bytes <= x_budget:
            thw = t
            break

    def total_vmem(tn, t):
        lane_acc = 128 if (t % 128 == 0 and t // 128 <= _MAX_LANE_UNROLL) else 1
        x_bytes = tn * c * t * elem_bytes
        acc_bytes = tn * (c + 8) * lane_acc * 4
        w_bytes = (c + 8) * nk_pad * 4
        out_bytes = tn * 8 * nk_pad * 4
        return 3 * x_bytes + acc_bytes + 2 * w_bytes + 2 * out_bytes

    divisors = [d for d in range(n, 0, -1) if n % d == 0]
    tn = 1
    for d in divisors:
        if d * c * thw * elem_bytes <= x_budget and total_vmem(d, thw) <= vmem_limit:
            tn = d
            break
    # v7x megacore: keep the "parallel" N axis at >= 2 iterations when possible
    # (cheap on single-TC chips: one extra grid step, same total bytes).
    if n >= 2 and n // tn < 2:
        for d in divisors:
            if d <= n // 2 and total_vmem(d, thw) <= vmem_limit:
                tn = d
                break
    # Safety: if even TN == 1 overflows the limit, shrink THW (keep divisibility).
    ci = cands.index(thw)
    while total_vmem(tn, thw) > vmem_limit and ci + 1 < len(cands):
        ci += 1
        thw = cands[ci]
    return tn, thw


def multi_head_forward(x_nchw, gamma, beta, w, bias):
    """x_nchw: (N, C, H, W)
       gamma, beta: (NUM_CLIENTS, C) LayerNorm params per head
       w: (NUM_CLIENTS, C, K) Linear weights (pre-transposed), bias: (NUM_CLIENTS, K)
       returns (N, K, 10)"""
    n, c, h, wd = x_nchw.shape
    k = w.shape[-1]
    hw = h * wd
    nk = NUM_ACTIVE_HEADS * k
    nk_pad = ((nk + 127) // 128) * 128

    # NCHW -> (N, C, HW): pure reshape, no HBM transpose.  The kernel upcasts
    # in-register, so bf16 activations stream as bf16 (half the HBM bytes).
    x = x_nchw.reshape(n, c, hw)

    # Fold per-head LayerNorm affine + 1/HW into the Linear layer (exact: the
    # head is affine between LN and the pool, dropout p=0 is identity), and
    # concatenate the 10 active heads along a zero-padded lane-dense output dim:
    #   mean_hw(g*xn + b) @ W + bias
    #     == sum_hw(xn) @ (g[:,None]*W / HW) + (b @ W + bias)
    g = gamma[:NUM_ACTIVE_HEADS].astype(jnp.float32)        # (10, C)
    bt = beta[:NUM_ACTIVE_HEADS].astype(jnp.float32)        # (10, C)
    wt = w[:NUM_ACTIVE_HEADS].astype(jnp.float32)           # (10, C, K)
    bs = bias[:NUM_ACTIVE_HEADS].astype(jnp.float32)        # (10, K)
    w_folded = (jnp.transpose(g[:, :, None] * wt, (1, 0, 2)).reshape(c, nk)
                * (1.0 / hw))
    b_folded = (jnp.einsum("hc,hck->hk", bt, wt) + bs).reshape(1, nk)
    if nk_pad != nk:
        w_folded = jnp.pad(w_folded, ((0, 0), (0, nk_pad - nk)))
        b_folded = jnp.pad(b_folded, ((0, 0), (0, nk_pad - nk)))

    vmem_limit = _vmem_limit_bytes()
    elem = jnp.dtype(x.dtype).itemsize
    tn, thw = _choose_tiles(n, c, hw, elem, nk_pad, vmem_limit)
    grid = (n // tn, hw // thw)

    defer = (thw % 128 == 0) and (thw // 128 <= _MAX_LANE_UNROLL)
    lane_acc = 128 if defer else 1

    # Deepen prefetch only when HW forces many small tiles per N block.
    x_spec_kwargs = {}
    if grid[1] >= 4 and tn * c * thw * elem < (2 << 20):
        x_spec_kwargs["pipeline_mode"] = pl.Buffered(3)
    x_spec = pl.BlockSpec((tn, c, thw), lambda i, j: (i, 0, j), **x_spec_kwargs)

    kernel = functools.partial(fused_ln_pool_head_kernel, inv_c=1.0 / c,
                               lane_acc=lane_acc, defer_lane_reduce=defer)

    slab = pl.pallas_call(
        kernel,
        out_shape=jax.ShapeDtypeStruct((n, 1, nk_pad), jnp.float32),
        grid=grid,
        in_specs=[
            x_spec,                                            # x tile
            pl.BlockSpec((c, nk_pad), lambda i, j: (0, 0)),    # W' resident
            pl.BlockSpec((1, nk_pad), lambda i, j: (0, 0)),    # b' resident
        ],
        out_specs=pl.BlockSpec((tn, 1, nk_pad), lambda i, j: (i, 0, 0)),
        scratch_shapes=[pltpu.VMEM((tn, c, lane_acc), jnp.float32),
                        pltpu.VMEM((tn, 1, lane_acc), jnp.float32)],
        compiler_params=pltpu.CompilerParams(
            dimension_semantics=("parallel", "arbitrary"),
            vmem_limit_bytes=vmem_limit,
        ),
    )(x, w_folded, b_folded)

    # (N, 1, NKpad) -> strip padding -> (N, 10, K) -> (N, K, 10): tiny layout
    # plumbing done in XLA.
    out = slab[:, 0, :nk].reshape(n, NUM_ACTIVE_HEADS, k)
    return jnp.transpose(out, (0, 2, 1))


# --------------------------------------------------------------------------
# Pure-JAX reference (mirrors the PyTorch module exactly).
# --------------------------------------------------------------------------
def reference(x_nchw, gamma, beta, w, bias):
    xt = jnp.transpose(x_nchw, (0, 2, 3, 1))                 # (N,H,W,C)
    mu = jnp.mean(xt, axis=-1, keepdims=True)
    var = jnp.mean((xt - mu) ** 2, axis=-1, keepdims=True)
    xn = (xt - mu) / jnp.sqrt(var + LN_EPS)
    outs = []
    for i in range(NUM_ACTIVE_HEADS):
        y = xn * gamma[i] + beta[i]                          # (N,H,W,C)
        pooled = jnp.mean(y, axis=(1, 2))                    # (N,C)
        outs.append(pooled @ w[i] + bias[i])                 # (N,K)
    o = jnp.stack(outs, axis=1)                              # (N,10,K)
    return jnp.swapaxes(o, -1, -2)                           # (N,K,10)


if __name__ == "__main__":
    N, C, H, W = 2, 32, 16, 16
    CLASSES = 8

    key = jax.random.PRNGKey(0)
    kx, kg, kbt, kw, kb = jax.random.split(key, 5)

    x = jax.random.normal(kx, (N, C, H, W), dtype=jnp.float32)

    # Non-trivial LayerNorm affine params so the gamma/beta -> W/bias fold is
    # actually exercised (PyTorch init is gamma=1, beta=0; values are learned).
    gamma = 1.0 + 0.1 * jax.random.normal(kg, (NUM_CLIENTS, C), dtype=jnp.float32)
    beta = 0.1 * jax.random.normal(kbt, (NUM_CLIENTS, C), dtype=jnp.float32)
    bound = 1.0 / np.sqrt(C)
    w = jax.random.uniform(kw, (NUM_CLIENTS, C, CLASSES),
                           minval=-bound, maxval=bound, dtype=jnp.float32)
    bias = jax.random.uniform(kb, (NUM_CLIENTS, CLASSES),
                              minval=-bound, maxval=bound, dtype=jnp.float32)

    out = jax.jit(multi_head_forward)(x, gamma, beta, w, bias)
    out = jax.block_until_ready(out)

    ref = reference(x, gamma, beta, w, bias)
    assert out.shape == (N, CLASSES, NUM_ACTIVE_HEADS), out.shape
    np.testing.assert_allclose(np.asarray(out), np.asarray(ref),
                               rtol=1e-4, atol=1e-4)
    print("KERNEL_OK")
</pallas_src>

<mosaic_0001>
module attributes {stable_mosaic.version = 11 : i64} {
  func.func @fused_ln_pool_head_kernel(%arg0: i32, %arg1: i32, %arg2: memref<1x32x256xf32, #tpu.memory_space<vmem>>, %arg3: memref<32x128xf32, #tpu.memory_space<vmem>>, %arg4: memref<1x128xf32, #tpu.memory_space<vmem>>, %arg5: memref<1x1x128xf32, #tpu.memory_space<vmem>>, %arg6: memref<1x32x128xf32, #tpu.memory_space<vmem>>, %arg7: memref<1x1x128xf32, #tpu.memory_space<vmem>>) attributes {dimension_semantics = [#tpu.dimension_semantics<parallel>, #tpu.dimension_semantics<arbitrary>], iteration_bounds = array<i64: 2, 1>, scalar_prefetch = 0 : i64, scratch_operands = 2 : i64, tpu.core_type = #tpu.core_type<tc>, window_params = [{transform_indices = @transform_0, window_bounds = array<i64: 1, 32, 256>}, {pipeline_mode = #tpu.pipeline_mode<synchronous>, transform_indices = @transform_1, window_bounds = array<i64: 32, 128>}, {pipeline_mode = #tpu.pipeline_mode<synchronous>, transform_indices = @transform_2, window_bounds = array<i64: 1, 128>}, {transform_indices = @transform_3, window_bounds = array<i64: 1, 1, 128>}]} {
    %c0_i32 = arith.constant 0 : i32
    %0 = arith.cmpi eq, %arg1, %c0_i32 : i32
    %1 = arith.extui %0 : i1 to i32
    %c0_i32_0 = arith.constant 0 : i32
    %2 = arith.cmpi ne, %1, %c0_i32_0 : i32
    scf.if %2 {
      %cst_21 = arith.constant 0.000000e+00 : f32
      %36 = vector.broadcast %cst_21 : f32 to vector<1x32x128xf32>
      %c0_22 = arith.constant 0 : index
      %c0_23 = arith.constant 0 : index
      %c0_24 = arith.constant 0 : index
      %37 = vector.load %arg6[%c0_22, %c0_23, %c0_24] : memref<1x32x128xf32, #tpu.memory_space<vmem>>, vector<1x32x128xf32>
      tpu.vector_store %arg6[%c0_22, %c0_23, %c0_24], %36 {strides = array<i32>} : memref<1x32x128xf32, #tpu.memory_space<vmem>>, vector<1x32x128xf32>,
      %cst_25 = arith.constant 0.000000e+00 : f32
      %38 = vector.broadcast %cst_25 : f32 to vector<1x1x128xf32>
      %c0_26 = arith.constant 0 : index
      %c0_27 = arith.constant 0 : index
      %c0_28 = arith.constant 0 : index
      %39 = vector.load %arg7[%c0_26, %c0_27, %c0_28] : memref<1x1x128xf32, #tpu.memory_space<vmem>>, vector<1x1x128xf32>
      tpu.vector_store %arg7[%c0_26, %c0_27, %c0_28], %38 {strides = array<i32>} : memref<1x1x128xf32, #tpu.memory_space<vmem>>, vector<1x1x128xf32>,
    } else {
    }
    %c0 = arith.constant 0 : index
    %c0_1 = arith.constant 0 : index
    %c0_2 = arith.constant 0 : index
    %3 = vector.load %arg2[%c0, %c0_1, %c0_2] : memref<1x32x256xf32, #tpu.memory_space<vmem>>, vector<1x32x256xf32>
    %cst = arith.constant dense<0.000000e+00> : vector<1x256xf32>
    %4 = vector.multi_reduction <add>, %3, %cst [1] : vector<1x32x256xf32> to vector<1x256xf32>
    %5 = vector.shape_cast %4 : vector<1x256xf32> to vector<1x1x256xf32>
    %6 = arith.mulf %3, %3 : vector<1x32x256xf32>
    %cst_3 = arith.constant dense<0.000000e+00> : vector<1x256xf32>
    %7 = vector.multi_reduction <add>, %6, %cst_3 [1] : vector<1x32x256xf32> to vector<1x256xf32>
    %8 = vector.shape_cast %7 : vector<1x256xf32> to vector<1x1x256xf32>
    %cst_4 = arith.constant 3.125000e-02 : f32
    %9 = vector.broadcast %cst_4 : f32 to vector<1x1x256xf32>
    %10 = arith.mulf %5, %9 : vector<1x1x256xf32>
    %cst_5 = arith.constant 3.125000e-02 : f32
    %11 = vector.broadcast %cst_5 : f32 to vector<1x1x256xf32>
    %12 = arith.mulf %8, %11 : vector<1x1x256xf32>
    %13 = arith.mulf %10, %10 : vector<1x1x256xf32>
    %14 = arith.subf %12, %13 : vector<1x1x256xf32>
    %cst_6 = arith.constant 9.99999974E-6 : f32
    %15 = vector.broadcast %cst_6 : f32 to vector<1x1x256xf32>
    %16 = arith.addf %14, %15 : vector<1x1x256xf32>
    %17 = math.rsqrt %16 : vector<1x1x256xf32>
    %18 = vector.broadcast %17 : vector<1x1x256xf32> to vector<1x32x256xf32>
    %19 = arith.mulf %3, %18 : vector<1x32x256xf32>
    %20 = arith.mulf %10, %17 : vector<1x1x256xf32>
    %21 = vector.extract_strided_slice %19 {offsets = [0, 0, 0], sizes = [1, 32, 128], strides = [1, 1, 1]} : vector<1x32x256xf32> to vector<1x32x128xf32>
    %22 = vector.extract_strided_slice %20 {offsets = [0, 0, 0], sizes = [1, 1, 128], strides = [1, 1, 1]} : vector<1x1x256xf32> to vector<1x1x128xf32>
    %23 = vector.extract_strided_slice %19 {offsets = [0, 0, 128], sizes = [1, 32, 128], strides = [1, 1, 1]} : vector<1x32x256xf32> to vector<1x32x128xf32>
    %24 = arith.addf %21, %23 : vector<1x32x128xf32>
    %25 = vector.extract_strided_slice %20 {offsets = [0, 0, 128], sizes = [1, 1, 128], strides = [1, 1, 1]} : vector<1x1x256xf32> to vector<1x1x128xf32>
    %26 = arith.addf %22, %25 : vector<1x1x128xf32>
    %c0_7 = arith.constant 0 : index
    %c0_8 = arith.constant 0 : index
    %c0_9 = arith.constant 0 : index
    %27 = vector.load %arg6[%c0_7, %c0_8, %c0_9] : memref<1x32x128xf32, #tpu.memory_space<vmem>>, vector<1x32x128xf32>
    %28 = arith.addf %27, %24 : vector<1x32x128xf32>
    %c0_10 = arith.constant 0 : index
    %c0_11 = arith.constant 0 : index
    %c0_12 = arith.constant 0 : index
    %29 = vector.load %arg6[%c0_10, %c0_11, %c0_12] : memref<1x32x128xf32, #tpu.memory_space<vmem>>, vector<1x32x128xf32>
    tpu.vector_store %arg6[%c0_10, %c0_11, %c0_12], %28 {strides = array<i32>} : memref<1x32x128xf32, #tpu.memory_space<vmem>>, vector<1x32x128xf32>,
    %c0_13 = arith.constant 0 : index
    %c0_14 = arith.constant 0 : index
    %c0_15 = arith.constant 0 : index
    %30 = vector.load %arg7[%c0_13, %c0_14, %c0_15] : memref<1x1x128xf32, #tpu.memory_space<vmem>>, vector<1x1x128xf32>
    %31 = arith.addf %30, %26 : vector<1x1x128xf32>
    %c0_16 = arith.constant 0 : index
    %c0_17 = arith.constant 0 : index
    %c0_18 = arith.constant 0 : index
    %32 = vector.load %arg7[%c0_16, %c0_17, %c0_18] : memref<1x1x128xf32, #tpu.memory_space<vmem>>, vector<1x1x128xf32>
    tpu.vector_store %arg7[%c0_16, %c0_17, %c0_18], %31 {strides = array<i32>} : memref<1x1x128xf32, #tpu.memory_space<vmem>>, vector<1x1x128xf32>,
    %c0_i32_19 = arith.constant 0 : i32
    %33 = arith.cmpi eq, %arg1, %c0_i32_19 : i32
    %34 = arith.extui %33 : i1 to i32
    %c0_i32_20 = arith.constant 0 : i32
    %35 = arith.cmpi ne, %34, %c0_i32_20 : i32
    scf.if %35 {
      %c0_21 = arith.constant 0 : index
      %c0_22 = arith.constant 0 : index
      %c0_23 = arith.constant 0 : index
      %36 = vector.load %arg6[%c0_21, %c0_22, %c0_23] : memref<1x32x128xf32, #tpu.memory_space<vmem>>, vector<1x32x128xf32>
      %cst_24 = arith.constant dense<0.000000e+00> : vector<1x32xf32>
      %37 = vector.multi_reduction <add>, %36, %cst_24 [2] : vector<1x32x128xf32> to vector<1x32xf32>
      %c0_25 = arith.constant 0 : index
      %c0_26 = arith.constant 0 : index
      %c0_27 = arith.constant 0 : index
      %38 = vector.load %arg7[%c0_25, %c0_26, %c0_27] : memref<1x1x128xf32, #tpu.memory_space<vmem>>, vector<1x1x128xf32>
      %cst_28 = arith.constant dense<0.000000e+00> : vector<1x1xf32>
      %39 = vector.multi_reduction <add>, %38, %cst_28 [2] : vector<1x1x128xf32> to vector<1x1xf32>
      %40 = vector.broadcast %39 : vector<1x1xf32> to vector<1x32xf32>
      %41 = arith.subf %37, %40 : vector<1x32xf32>
      %c0_29 = arith.constant 0 : index
      %c0_30 = arith.constant 0 : index
      %42 = vector.load %arg3[%c0_29, %c0_30] : memref<32x128xf32, #tpu.memory_space<vmem>>, vector<32x128xf32>
      %cst_31 = arith.constant dense<0.000000e+00> : vector<1x128xf32>
      %43 = tpu.matmul %41, %42, %cst_31 {dimension_numbers = #tpu.dot_dimension_numbers<[1], [0], [0], [1], [0, 0, 1, 1], [], []>} : vector<1x32xf32>, vector<32x128xf32>, vector<1x128xf32> -> vector<1x128xf32>
      %c0_32 = arith.constant 0 : index
      %c0_33 = arith.constant 0 : index
      %44 = vector.load %arg4[%c0_32, %c0_33] : memref<1x128xf32, #tpu.memory_space<vmem>>, vector<1x128xf32>
      %45 = arith.addf %43, %44 : vector<1x128xf32>
      %46 = vector.shape_cast %45 : vector<1x128xf32> to vector<1x1x128xf32>
      %c0_34 = arith.constant 0 : index
      %c0_35 = arith.constant 0 : index
      %c0_36 = arith.constant 0 : index
      %47 = vector.load %arg5[%c0_34, %c0_35, %c0_36] : memref<1x1x128xf32, #tpu.memory_space<vmem>>, vector<1x1x128xf32>
      tpu.vector_store %arg5[%c0_34, %c0_35, %c0_36], %46 {strides = array<i32>} : memref<1x1x128xf32, #tpu.memory_space<vmem>>, vector<1x1x128xf32>,
    } else {
    }
    return
  }
  func.func @transform_0(%arg0: i32, %arg1: i32) -> (i32, i32, i32) {
    %c0_i32 = arith.constant 0 : i32
    %c0_i32_0 = arith.constant 0 : i32
    return %arg0, %c0_i32, %arg1 : i32, i32, i32
  }
  func.func @transform_1(%arg0: i32, %arg1: i32) -> (i32, i32) {
    %c0_i32 = arith.constant 0 : i32
    %c0_i32_0 = arith.constant 0 : i32
    %c0_i32_1 = arith.constant 0 : i32
    return %c0_i32, %c0_i32_0 : i32, i32
  }
  func.func @transform_2(%arg0: i32, %arg1: i32) -> (i32, i32) {
    %c0_i32 = arith.constant 0 : i32
    %c0_i32_0 = arith.constant 0 : i32
    %c0_i32_1 = arith.constant 0 : i32
    return %c0_i32, %c0_i32_0 : i32, i32
  }
  func.func @transform_3(%arg0: i32, %arg1: i32) -> (i32, i32, i32) {
    %c0_i32 = arith.constant 0 : i32
    %c0_i32_0 = arith.constant 0 : i32
    %c0_i32_1 = arith.constant 0 : i32
    return %arg0, %c0_i32, %c0_i32_0 : i32, i32, i32
  }
}

</mosaic_0001>

<bundles_post_ra>
// kernel: squeeze.1
= control target key start
LH: loop header
LB: loop body
LE: loop exit
PB: predicated region body
PF: predicated region fallthrough
CT: control target
= control target key end

     0   :  { %s82_s8 = smov 104   ;;  %vm7_vm0 = vcmask 64512   ;;  %s83_s11 = smov 112   ;;  %s143_s0 = inlined_call_operand.vmem [shape: f32[2,80], index: 0, kind: input, shape index: {}]   ;;  %s144_s1 = inlined_call_operand.vmem [shape: f32[2,10,8], index: 1, kind: output, shape index: {}]  }
   0x1   :  { %v4_v0 = vld [vmem:[%s143_s0] sm:$0x3]  ;;  %s81_s0 = smov 120   ;;  %s84_s12 = smov 96  }
   0x2   :  { %5 = vst [vmem:[#allocation0] sm:$0x3] %v4_v0  ;;  %s85_s13 = smov 88   ;;  %s86_s14 = smov 80  }
   0x3   :  { %s87_s15 = smov 72   ;;  %s88_s16 = smov 64  }
   0x4   :  { %s89_s17 = smov 56  }
   0x9   :  { %v9_v1 = vld [vmem:[#allocation0] sm:$0x3]  }
   0xa   :  { %v21_v2 = vld [vmem:[#allocation0] sm:$0x3]   ;;  %10 = vrot.lane.b32.xlu0 %v9_v1, %s81_s0 }
   0xb   :  { %22 = vrot.lane.b32.xlu1 %v21_v2, %s82_s8  ;;  %v15_v3 = vld [vmem:[#allocation0] sm:$0x3]  }
   0xc   :  { %v27_v4 = vld [vmem:[#allocation0] sm:$0x3]  }
   0xd   :  { %v6_v5 = vld [vmem:[#allocation0] sm:$0x3]  }
   0xe   :  { %8 = vst.msk [vmem:[%s144_s1] ss:$16 sm:$0x3] %vm7_vm0, %v6_v5   ;;  %16 = vrot.lane.b32.xlu0 %v15_v3, %s83_s11  ;;  %v33_v6 = vld [vmem:[#allocation0] sm:$0x3]  }
   0xf   :  { %28 = vrot.lane.b32.xlu1 %v27_v4, %s84_s12  ;;  %v39_v7 = vld [vmem:[#allocation0] sm:$0x3]  }
  0x10   :  { %v45_v8 = vld [vmem:[#allocation0] sm:$0x3]  }
  0x11   :  { %v51_v9 = vld [vmem:[#allocation0] sm:$0x3]  }
  0x12   :  { %34 = vrot.lane.b32.xlu0 %v33_v6, %s85_s13  ;;  %v57_v10 = vld [vmem:[#allocation0] sm:$0x3]  }
  0x13   :  { %40 = vrot.lane.b32.xlu1 %v39_v7, %s86_s14 }
  0x16   :  { %46 = vrot.lane.b32.xlu0 %v45_v8, %s87_s15 }
  0x17   :  { %52 = vrot.lane.b32.xlu1 %v51_v9, %s88_s16 }
  0x1a   :  { %58 = vrot.lane.b32.xlu0 %v57_v10, %s89_s17 }
  0x7c   :  { %v11_v11 = vpop.permute.xlu0 %10  }
  0x7d   :  { %v23_v12 = vpop.permute.xlu1 %22   ;;  %63 = vst.msk [vmem:[%s144_s1 + $0x1] ss:$16 sm:$0x3] %vm7_vm0, %v11_v11  }
  0x7e   :  { %65 = vst.msk [vmem:[%s144_s1 + $0x3] ss:$16 sm:$0x3] %vm7_vm0, %v23_v12  }
  0x80   :  { %v17_v13 = vpop.permute.xlu0 %16  }
  0x81   :  { %v29_v14 = vpop.permute.xlu1 %28   ;;  %64 = vst.msk [vmem:[%s144_s1 + $0x2] ss:$16 sm:$0x3] %vm7_vm0, %v17_v13  }
  0x82   :  { %66 = vst.msk [vmem:[%s144_s1 + $0x4] ss:$16 sm:$0x3] %vm7_vm0, %v29_v14  }
  0x84   :  { %v35_v15 = vpop.permute.xlu0 %34  }
  0x85   :  { %v41_v16 = vpop.permute.xlu1 %40   ;;  %67 = vst.msk [vmem:[%s144_s1 + $0x5] ss:$16 sm:$0x3] %vm7_vm0, %v35_v15  }
  0x86   :  { %68 = vst.msk [vmem:[%s144_s1 + $0x6] ss:$16 sm:$0x3] %vm7_vm0, %v41_v16  }
  0x88   :  { %v47_v17 = vpop.permute.xlu0 %46  }
  0x89   :  { %v53_v18 = vpop.permute.xlu1 %52   ;;  %69 = vst.msk [vmem:[%s144_s1 + $0x7] ss:$16 sm:$0x3] %vm7_vm0, %v47_v17  }
  0x8a   :  { %70 = vst.msk [vmem:[%s144_s1 + $0x8] ss:$16 sm:$0x3] %vm7_vm0, %v53_v18  }
  0x8c   :  { %v59_v19 = vpop.permute.xlu0 %58  }
  0x8d   :  { %71 = vst.msk [vmem:[%s144_s1 + $0x9] ss:$16 sm:$0x3] %vm7_vm0, %v59_v19  }

// kernel: multi_head_forward.1
= control target key start
LH: loop header
LB: loop body
LE: loop exit
PB: predicated region body
PF: predicated region fallthrough
CT: control target
= control target key end

     0   :  { %8 = vsyncpa [#allocation5], 0  ;;  %s1244_s0 = inlined_call_operand.hbm [shape: f32[2,32,256], index: 0, kind: input, shape index: {}]   ;;  %s1245_s1 = inlined_call_operand.hbm [shape: f32[32,128], index: 1, kind: input, shape index: {}]   ;;  %s1246_s2 = inlined_call_operand.hbm [shape: f32[1,128], index: 2, kind: input, shape index: {}]   ;;  %s1247_s3 = inlined_call_operand.hbm [shape: f32[2,1,128], index: 3, kind: output, shape index: {}]  }
   0x1   :  { %10 = vsyncpa [#allocation5 + $0x1], 0 }
   0x2   :  { %11 = vsyncpa [#allocation8], 0 }
   0x3   :  { %12 = vsyncpa [#allocation6], 0 }
   0x4   :  { %14 = vsyncpa [#allocation6 + $0x1], 0  ;;  %s939_s12 = smov 0   ;;  %s941_s13 = smov 0  }
   0x5   :  { %s943_s14 = smov 0   ;;  %s945_s15 = smov 0  }
   0x6   :  { %s947_s16 = smov 0   ;;  %s949_s17 = smov 0  }
   0x7 LB: > { %s596_s18 = sadd.s32 4294967295, %s905_s17   ;;  %s597_s19 = sadd.s32 4294967294, %s905_s17   ;;  %s905_s17 = sphi %s949_s17, %s20_s17   ;;  %s901_s16 = sphi %s947_s16, %s1269_s16   ;;  %s897_s15 = sphi %s945_s15, %s1268_s15   ;;  %s893_s14 = sphi %s943_s14, %s1267_s14   ;;  %s889_s13 = sphi %s941_s13, %s1266_s13   ;;  %s885_s12 = sphi %s939_s12, %s1265_s12  }
   0x8   : > { %p54_p0 = scmp.ne.s32.totalorder %s889_s13, %s885_s12  ;;  %p973_p1 = scmp.eq.s32.totalorder %s596_s18, 0 }
   0x9   : > { %p977_p2 = scmp.eq.s32.totalorder %s596_s18, 1  ;;  %p126_p3 = scmp.eq.s32.totalorder %s597_s19, 1 }
   0xa   : > { %s1252_s20 = scalar_select %p973_p1, 1, 0 }
   0xb   : > { %p983_p4 = por %p973_p1, %p54_p0  ;;  %p598_p5 = scmp.ge.s32.totalorder %s905_s17, 1 }
   0xc   : > { %p988_p6 = por %p126_p3, %p54_p0  ;;  %p133_p7 = scmp.lt.s32.totalorder %s905_s17, 3 }
   0xd   : > { %s1254_s22 = scalar_select %p983_p4, 1, 0 }
   0xe   : > { %s1255_s23 = scalar_select %p988_p6, 1, 0 }
   0xf   : > { %p993_p8 = pnand %p598_p5, %p133_p7  ;;  %s907_s25 = smov [#allocation7]  }
  0x10   : > { %s145_s26 = sshll.u32 %s907_s25, 4  ;;  %s908_s28 = smov [#allocation9]   ;;  %s997_s26 = int_to_ptr.vmem [resolvable:$true] %s145_s26 }
  0x11   : > { %p648_p9 = pneg %p993_p8  ;;  %s159_s29 = sshll.u32 %s908_s28, 4  ;;  %s1008_s29 = int_to_ptr.vmem [resolvable:$true] %s159_s29 }
  0x12   : > { %s733_s5 = scalar_lea.hbm %s1245_s1, 512 }
  0x13   : > { %p1004_p11 = pnand %p648_p9, %p973_p1  ;;  %p734_p12 = scmp.ne.s32.totalorder %s1245_s1, %s733_s5 }
  0x14   : > { %p740_p5 = scmp.lt.u32.totalorder %s733_s5, %s1245_s1 }
  0x15   : > { %p735_p13 = pneg %p1004_p11 }
  0x17   : > { %p736_p0 = pnand %p735_p13, %p734_p12 }
  0x19   : > { %p737_p3 = pneg %p736_p0 }
  0x1b   : > { %p742_p7 = pnand %p740_p5, %p737_p3 }
  0x1d   : > { %745 = shalt.err (!%p742_p7)
}
  0x1e   : > { %s746_s10 = scalar_lea.vmem %s997_s26, 512  ;;  %p754_p1 = scmp.lt.s32.totalorder %s997_s26, %s997_s26 }
  0x1f   : > { %p747_p9 = scmp.ne.s32.totalorder %s997_s26, %s746_s10  ;;  %p755_p12 = scmp.lt.s32.totalorder %s746_s10, %s746_s10 }
  0x21   : > { %p749_p10 = pnand %p747_p9, %p735_p13  ;;  %p756_p0 = por %p755_p12, %p754_p1 }
  0x23   : > { %p750_p6 = pneg %p749_p10 }
  0x25   : > { %p757_p4 = pnand %p756_p0, %p750_p6 }
  0x27   : > { %760 = shalt.err (!%p757_p4)
}
  0x28   : > { %s909_s11 = smov 128   ;;  %s910_s18 = smov 8  }
  0x29   : > { %651 = dma.hbm_to_vmem [thread:$0]  (!%p1004_p11), %s1245_s1, 512, %s997_s26, [#allocation8], %s909_s11, %s909_s11, %s910_s18  }
  0x2a   : > { %s761_s4 = scalar_lea.hbm %s1246_s2, 16 }
  0x2b   : > { %p762_p1 = scmp.ne.s32.totalorder %s1246_s2, %s761_s4  ;;  %p768_p10 = scmp.lt.u32.totalorder %s761_s4, %s1246_s2 }
  0x2d   : > { %p764_p4 = pnand %p762_p1, %p735_p13 }
  0x2f   : > { %p765_p6 = pneg %p764_p4 }
  0x31   : > { %p770_p3 = pnand %p768_p10, %p765_p6 }
  0x33   : > { %773 = shalt.err (!%p770_p3)
}
  0x34   : > { %s774_s26 = scalar_lea.vmem %s1008_s29, 16  ;;  %s781_s9 = scalar_lea.vmem %s1008_s29, 32 }
  0x35   : > { %p775_p5 = scmp.ne.s32.totalorder %s1008_s29, %s774_s26  ;;  %p782_p12 = scmp.lt.s32.totalorder %s1008_s29, %s1008_s29 }
  0x36   : > { %p783_p0 = scmp.lt.s32.totalorder %s781_s9, %s774_s26 }
  0x37   : > { %p777_p7 = pnand %p775_p5, %p735_p13 }
  0x38   : > { %p784_p1 = por %p783_p0, %p782_p12 }
  0x39   : > { %p778_p9 = pneg %p777_p7 }
  0x3b   : > { %p785_p4 = pnand %p784_p1, %p778_p9 }
  0x3d   : > { %788 = shalt.err (!%p785_p4)
}
  0x3e   : > { %654 = dma.hbm_to_vmem [thread:$0]  (!%p1004_p11), %s1246_s2, 16, %s1008_s29, [#allocation8]  }
  0x3f   : > { %s32_s18 = sadd.s32 1, %s901_s16  ;;  %s41_s19 = sadd.s32 1, %s893_s14 }
  0x40   : > { %p34_p13 = scmp.ge.s32.totalorder %s32_s18, 2  ;;  %p48_p6 = scmp.ne.s32.totalorder %s893_s14, %s889_s13 }
  0x41   : > { %p49_p10 = scmp.eq.s32.totalorder %s905_s17, 0  ;;  %p665_p3 = scmp.lt.s32.totalorder %s905_s17, 2 }
  0x42   : > { %s1271_s18 = smov (%p34_p13, %s32_s18), 0  ;;  %p1073_p7 = por %p977_p2, %p48_p6 }
  0x43   : > { %p50_p5 = por %p49_p10, %p48_p6  ;;  %s36_s25 = ssub.s32 %s901_s16, %s1271_s18 }
  0x44   : > { %s1258_s27 = scalar_select %p1073_p7, 1, 0 }
  0x45   : > { %s170_s28 = sand.u32 1, %s893_s14   ;;  %p39_p9 = scmp.eq.s32.totalorder %s36_s25, 0 }
  0x46   : > { %s602_s29 = sshll.u32 %s170_s28, 6  ;;  %s613_s30 = sshll.u32 %s901_s16, 10 }
  0x47   : > { %s1082_s4 = scalar_select %p39_p9, %s893_s14, %s41_s19  }
  0x48   : > { %s1087_s7 = scalar_lea.hbm %s1244_s0, %s613_s30  ;;  %s174_s21 = scalar_lea.vmem [#allocation4], %s602_s29 }
  0x49   : > { %s183_s8 = sshll.u32 %s174_s21, 4  ;;  %p1091_p2 = pnand %p665_p3, %p50_p5  ;;  %s1095_s8 = int_to_ptr.vmem [resolvable:$true] %s183_s8 }
  0x4a   : > { %s1097_s9 = scalar_lea.sflag [#allocation5], %s170_s28  ;;  %s789_s10 = scalar_lea.hbm %s1087_s7, 1024 }
  0x4b   : > { %p790_p11 = scmp.ne.s32.totalorder %s1087_s7, %s789_s10  ;;  %p791_p12 = pneg %p1091_p2 }
  0x4c   : > { %s794_s25 = scalar_lea.hbm %s1244_s0, 2048  ;;  %p795_p4 = scmp.lt.u32.totalorder %s1087_s7, %s1244_s0 }
  0x4d   : > { %p792_p0 = pnand %p791_p12, %p790_p11  ;;  %p796_p13 = scmp.lt.u32.totalorder %s794_s25, %s789_s10 }
  0x4e   : > { %p798_p10 = scmp.lt.u32.totalorder %s789_s10, %s1087_s7 }
  0x4f   : > { %p793_p1 = pneg %p792_p0  ;;  %p797_p6 = por %p796_p13, %p795_p4 }
  0x51   : > { %p799_p3 = por %p798_p10, %p797_p6 }
  0x53   : > { %p800_p5 = pnand %p799_p3, %p793_p1 }
  0x55   : > { %803 = shalt.err (!%p800_p5)
}
  0x56   : > { %s804_s28 = scalar_lea.vmem %s1095_s8, 1024  ;;  %s911_s5 = smov [#allocation4]  }
  0x57   : > { %p805_p9 = scmp.ne.s32.totalorder %s1095_s8, %s804_s28  ;;  %s809_s6 = sshll.u32 %s911_s5, 4  ;;  %s810_s6 = int_to_ptr.vmem [resolvable:$false] %s809_s6 }
  0x58   : > { %s811_s21 = scalar_lea.vmem %s810_s6, 2048  ;;  %p812_p7 = scmp.lt.s32.totalorder %s1095_s8, %s810_s6 }
  0x59   : > { %p807_p11 = pnand %p805_p9, %p791_p12  ;;  %p813_p4 = scmp.lt.s32.totalorder %s811_s21, %s804_s28 }
  0x5b   : > { %p808_p0 = pneg %p807_p11  ;;  %p814_p13 = por %p813_p4, %p812_p7 }
  0x5d   : > { %p815_p6 = pnand %p814_p13, %p808_p0 }
  0x5f   : > { %818 = shalt.err (!%p815_p6)
}
  0x60   : > { %s912_s10 = smov 256   ;;  %s913_s11 = smov 16  }
  0x61   : > { %658 = dma.hbm_to_vmem [thread:$0]  (!%p1091_p2), %s1087_s7, 1024, %s1095_s8, %s1097_s9, %s912_s10, %s912_s10, %s913_s11  }
  0x62   : > { %195 = sbr.rel (%p993_p8) target bundleno = 677 (0x2a5), region = 32  ;;  %s1128_s19 = sand.u32 (!%p993_p8), 1, %s889_s13  }
  0x63   : > { %s606_s25 = sshll.u32 (!%p993_p8), %s1128_s19, 6  ;;  %s198_s29 = scalar_lea.sflag (!%p993_p8), [#allocation5], %s1128_s19 }
  0x64   : > { %s201_s30 = scalar_lea.vmem (!%p993_p8), [#allocation4], %s606_s25  ;;  %p1260_p7 = scmp.ne.s32.totalorder (!%p993_p8), %s1254_s22, 0 }
  0x69   : > { %872 = dma.done.wait (%p1260_p7), %s198_s29, 1024  }
  0x6a   : > { %874 = vsyncadd (%p1260_p7), %s198_s29, 4294966272  ;;  %p1261_p12 = scmp.ne.s32.totalorder %s1252_s20, 0 }
  0x6c   : > { %876 = dma.done.wait (%p1261_p12), [#allocation8], 528  }
  0x6d   : > { %878 = vsyncadd (%p1261_p12), [#allocation8], 4294966768  ;;  %v914_v0 = vmov 0.0   ;;  %v1141_v1 = vld [vmem:[%s201_s30] sm:$0xff]  ;;  %v1143_v2 = vld [vmem:[%s201_s30 + $0x8] sm:$0xff]  ;;  %vm351_vm0 = vcmask 1040384  }
  0x6e   : > { %240 = vst [vmem:[#allocation3] sm:$0x1] %v914_v0  ;;  %v1145_v3 = vld [vmem:[%s201_s30 + $0x10] sm:$0xff]  ;;  %v1147_v4 = vld [vmem:[%s201_s30 + $0x18] sm:$0xff]  ;;  %v1149_v5 = vld [vmem:[%s201_s30 + $0x20] sm:$0xff]  ;;  %v267_v8 = vmul.f32 %v1141_v1, %v1141_v1  ;;  %v268_v9 = vmul.f32 %v1143_v2, %v1143_v2  ;;  %vm917_vm1 = vmmov 0  }
  0x6f   : > { %v1151_v6 = vld [vmem:[%s201_s30 + $0x28] sm:$0xff]  ;;  %v249_v7 = vadd.f32 %v1145_v3, %v1141_v1  ;;  %v269_v10 = vmul.f32 %v1145_v3, %v1145_v3  ;;  %v1161_v11 = vld [vmem:[%s201_s30 + $0x30] sm:$0xff]  ;;  %v1163_v12 = vld [vmem:[%s201_s30 + $0x38] sm:$0xff]  ;;  %v258_v13 = vadd.f32 %v1147_v4, %v1143_v2  ;;  %v270_v14 = vmul.f32 %v1147_v4, %v1147_v4  ;;  %627 = vmatprep.mubr.msk.f32.mxu0 %vm917_vm1, %v914_v0  ;;  %s610_s20 = sshll.u32 %s897_s15, 4  ;;  %s230_s22 = scalar_lea.vmem [#allocation10], %s1128_s19 }
  0x70   : > { %v271_v15 = vmul.f32 %v1149_v5, %v1149_v5  ;;  %v272_v16 = vmul.f32 %v1151_v6, %v1151_v6  ;;  %v273_v18 = vmul.f32 %v1161_v11, %v1161_v11  ;;  %v274_v21 = vmul.f32 %v1163_v12, %v1163_v12  ;;  %s500_s24 = sshll.u32 %s230_s22, 4  ;;  %s1195_s26 = scalar_lea.hbm %s1247_s3, %s610_s20  ;;  %s1197_s24 = int_to_ptr.vmem [resolvable:$true] %s500_s24 }
  0x71   : > { %v250_v17 = vadd.f32 %v249_v7, %v1149_v5  ;;  %v275_v19 = vadd.f32 %v269_v10, %v267_v8  ;;  %v259_v20 = vadd.f32 %v258_v13, %v1151_v6  ;;  %v284_v22 = vadd.f32 %v270_v14, %v268_v9  ;;  %s488_s9 = scalar_lea.sflag [#allocation6], %s1128_s19  ;;  %s819_s28 = scalar_lea.vmem %s1197_s24, 16 }
  0x72   : > { %vm397_vm2 = vcmask 130112   ;;  %vm404_vm3 = vcmask 195712   ;;  %vm411_vm4 = vcmask 261312   ;;  %vm413_vm5 = vcmask 261120   ;;  %p820_p8 = scmp.ne.s32.totalorder %s1197_s24, %s819_s28  ;;  %p1262_p2 = scmp.ne.s32.totalorder %s1258_s27, 0 }
  0x73   : > { %v251_v23 = vadd.f32 %v250_v17, %v1161_v11  ;;  %v276_v24 = vadd.f32 %v275_v19, %v271_v15  ;;  %v260_v25 = vadd.f32 %v259_v20, %v1163_v12  ;;  %v285_v26 = vadd.f32 %v284_v22, %v272_v16  ;;  %s918_s15 = smov [#allocation10]  }
  0x74   : > { %p821_p1 = pnand %p820_p8, %p1262_p2  ;;  %s823_s5 = sshll.u32 %s918_s15, 4  ;;  %s824_s5 = int_to_ptr.vmem [resolvable:$false] %s823_s5 }
  0x75   : > { %v252_v27 = vrot.slane %v251_v23, 4  ;;  %v277_v28 = vadd.f32 %v276_v24, %v273_v18  ;;  %v261_v29 = vrot.slane %v260_v25, 4  ;;  %v286_v30 = vadd.f32 %v285_v26, %v274_v21  ;;  %v332_v18 = vld [vmem:[#allocation3] sm:$0x1]  ;;  %s825_s6 = scalar_lea.vmem %s824_s5, 32  ;;  %p826_p3 = scmp.lt.s32.totalorder %s1197_s24, %s824_s5 }
  0x76   : > { %v356_v24 = vlaneseq  ;;  %p822_p10 = pneg %p821_p1  ;;  %p827_p5 = scmp.lt.s32.totalorder %s825_s6, %s819_s28 }
  0x77   : > { %v253_v31 = vadd.f32 %v252_v27, %v251_v23  ;;  %v278_v32 = vrot.slane %v277_v28, 4  ;;  %v262_v33 = vadd.f32 %v261_v29, %v260_v25  ;;  %v287_v34 = vrot.slane %v286_v30, 4 }
  0x78   : > { %v357_v25 = vshrl.u32 %v356_v24, 7  ;;  %p828_p9 = por %p827_p5, %p826_p3 }
  0x79   : > { %v254_v35 = vrot.slane %v253_v31, 2  ;;  %v279_v36 = vadd.f32 %v278_v32, %v277_v28  ;;  %v263_v37 = vrot.slane %v262_v33, 2  ;;  %v288_v38 = vadd.f32 %v287_v34, %v286_v30 }
  0x7a   : > { %v358_v27 = vsub.s32 0, %v357_v25  ;;  %p829_p11 = pnand %p828_p9, %p822_p10 }
  0x7b   : > { %v255_v39 = vadd.f32 %v254_v35, %v253_v31  ;;  %v280_v40 = vrot.slane %v279_v36, 2  ;;  %v264_v41 = vadd.f32 %v263_v37, %v262_v33  ;;  %v289_v42 = vrot.slane %v288_v38, 2  ;;  %v366_v33 = vld [vmem:[#allocation7 + $0x8] sm:$0xff] }
  0x7c   : > { %v916_v37 = vmov 0.0|0.0  }
  0x7d   : > { %v256_v43 = vrot.slane %v255_v39, 1  ;;  %v281_v44 = vadd.f32 %v280_v40, %v279_v36  ;;  %v265_v45 = vrot.slane %v264_v41, 1  ;;  %v290_v46 = vadd.f32 %v289_v42, %v288_v38  ;;  %630 = vmatprep.subr.bf16.mxu0 %v916_v37  ;;  %v367_v38 = vld [vmem:[#allocation7 + $0x10] sm:$0xff] }
  0x7e   : > { %v387_v42 = vand.u32 127, %v356_v24 }
  0x7f   : > { %v257_v47 = vadd.f32 %v256_v43, %v255_v39  ;;  %v282_v48 = vrot.slane %v281_v44, 1  ;;  %v266_v49 = vadd.f32 %v265_v45, %v264_v41  ;;  %v291_v50 = vrot.slane %v290_v46, 1  ;;  %v368_v39 = vld [vmem:[#allocation7 + $0x18] sm:$0xff] }
  0x80   : > { %v634_v41 = vpack.c.bf16 %v368_v39, %v367_v38  ;;  %v392_v43 = vadd.s32 4294967288, %v387_v42 }
  0x81   : > { %v283_v51 = vadd.f32 %v282_v48, %v281_v44  ;;  %v293_v52 = vmul.f32 0.03125, %v257_v47  ;;  %v292_v53 = vadd.f32 %v291_v50, %v290_v46  ;;  %v294_v54 = vmul.f32 0.03125, %v266_v49 }
  0x82   : > { %v399_v44 = vadd.s32 4294967280, %v387_v42  ;;  %v390_v46 = vsub.s32 %v387_v42, %v357_v25  ;;  %v395_v47 = vsub.s32 %v392_v43, %v357_v25  ;;  %v406_v48 = vadd.s32 4294967272, %v387_v42 }
  0x83   : > { %v295_v55 = vmul.f32 0.03125, %v283_v51  ;;  %v297_v56 = vmul.f32 %v293_v52, %v293_v52  ;;  %v296_v57 = vmul.f32 0.03125, %v292_v53  ;;  %v298_v58 = vmul.f32 %v294_v54, %v294_v54 }
  0x84   : > { %v402_v50 = vsub.s32 %v399_v44, %v357_v25 }
  0x85   : > { %v299_v59 = vsub.f32 %v295_v55, %v297_v56  ;;  %v300_v60 = vsub.f32 %v296_v57, %v298_v58 }
  0x87   : > { %v301_v61 = vadd.f32 1e-05, %v299_v59  ;;  %v302_v62 = vadd.f32 1e-05, %v300_v60  ;;  %v369_v60 = vld [vmem:[#allocation9] sm:$0x1] }
  0x89   : > { %729 = vrsqrt.f32 %v301_v61 }
  0x8a   : > { %731 = vrsqrt.f32 %v302_v62 }
  0x93   : > { %v730_v63 = vpop.eup %729 }
  0x94   : > { %v732_v7 = vpop.eup %731  ;;  %v305_v8 = vmul.f32 %v730_v63, %v1141_v1  ;;  %v313_v9 = vmul.f32 %v730_v63, %v293_v52  ;;  %v307_v10 = vmul.f32 %v730_v63, %v1145_v3  ;;  %v309_v13 = vmul.f32 %v730_v63, %v1149_v5 }
  0x95   : > { %v306_v14 = vmul.f32 %v732_v7, %v1143_v2  ;;  %v314_v15 = vmul.f32 %v732_v7, %v294_v54  ;;  %v308_v16 = vmul.f32 %v732_v7, %v1147_v4  ;;  %v310_v17 = vmul.f32 %v732_v7, %v1151_v6 }
  0x96   : > { %v311_v3 = vmul.f32 %v730_v63, %v1161_v11  ;;  %v312_v2 = vmul.f32 %v732_v7, %v1163_v12  ;;  %v915_v6 = vmov 0   ;;  %v365_v12 = vld [vmem:[#allocation7] sm:$0xff]  ;;  %v409_v54 = vsub.s32 %v406_v48, %v357_v25 }
  0x97   : > { %v315_v19 = vadd.f32 %v306_v14, %v305_v8  ;;  %v319_v20 = vadd.f32 %v314_v15, %v313_v9  ;;  %v316_v21 = vadd.f32 %v308_v16, %v307_v10  ;;  %v317_v1 = vadd.f32 %v310_v17, %v309_v13  ;;  %728 = vset.pattern.permute.xlu0 %v915_v6 }
  0x98   : > { %v318_v4 = vadd.f32 %v312_v2, %v311_v3  ;;  %727 = vset.pattern.permute.xlu1 %v915_v6  ;;  %v631_v35 = vpack.c.bf16 %v366_v33, %v365_v12 }
  0x99   : > { %342 = vadd.xlane.f32.xlu0 %v315_v19  ;;  %v333_v22 = vadd.f32 %v332_v18, %v319_v20  ;;  %344 = vadd.xlane.f32.xlu1 %v316_v21 }
  0x9a   : > { %632 = vmatpush3.bf16.msra.mxu0 %v631_v35 }
  0x9b   : > { %334 = vst [vmem:[#allocation3] sm:$0x1] %v333_v22  ;;  %633 = vmatprep.subr.bf16.mxu0 %v916_v37 }
  0x9d   : > { %346 = vadd.xlane.f32.xlu1 %v317_v1 }
  0x9e   : > { %635 = vmatpush3.bf16.msra.mxu0 %v634_v41 }
  0xa2   : > { %v350_v5 = vld [vmem:[#allocation3] sm:$0x1] }
  0xa3   : > { %v352_v23 = vsel %vm351_vm0, %v350_v5, 0.0 }
  0xa4   : > { %353 = vadd.xlane.f32.xlu0 %v352_v23 }
  0xa8   : > { %348 = vadd.xlane.f32.xlu0 %v318_v4 }
 0x126   : > { %v343_v26 = vpop.xlane.xlu0 %342  ;;  %v345_v28 = vpop.xlane.xlu1 %344 }
 0x12a   : > { %v347_v11 = vpop.xlane.xlu1 %346 }
 0x131   : > { %v354_v29 = vpop.xlane.xlu0 %353 }
 0x132   : > { %v359_v30 = vrot.slane %v354_v29, %v358_v27 }
 0x134   : > { %v362_v31 = vsub.f32 %v345_v28, %v359_v30  ;;  %v361_v32 = vsub.f32 %v343_v26, %v359_v30  ;;  %v363_v34 = vsub.f32 %v347_v11, %v359_v30 }
 0x135   : > { %v349_v36 = vpop.xlane.xlu0 %348 }
 0x136   : > { %378 = vperm.xlu0 %728, %v362_v31   ;;  %375 = vperm.xlu1 %727, %v361_v32   ;;  %v364_v40 = vsub.f32 %v349_v36, %v359_v30 }
 0x13a   : > { %381 = vperm.xlu1 %727, %v363_v34  }
 0x13e   : > { %384 = vperm.xlu1 %727, %v364_v40  }
 0x1b5   : > { %v376_v45 = vpop.permute.xlu1 %375  ;;  %v379_v49 = vpop.permute.xlu0 %378 }
 0x1b6   : > { %v391_v52 = vrot.slane %v376_v45, %v390_v46  ;;  %v396_v53 = vrot.slane %v379_v49, %v395_v47 }
 0x1b8   : > { %v398_v0 = vsel %vm397_vm2, %v396_v53, %v391_v52 }
 0x1b9   : > { %v382_v51 = vpop.permute.xlu1 %381 }
 0x1ba   : > { %v403_v55 = vrot.slane %v382_v51, %v402_v50 }
 0x1bc   : > { %v405_v58 = vsel %vm404_vm3, %v403_v55, %v398_v0 }
 0x1bd   : > { %v385_v56 = vpop.permute.xlu1 %384 }
 0x1be   : > { %v410_v57 = vrot.slane %v385_v56, %v409_v54 }
 0x1c0   : > { %v412_v59 = vsel %vm411_vm4, %v410_v57, %v405_v58 }
 0x1c1   : > { %628 = vmatmul.mubr.msk.f32.vlgmr.msra.gmra.mrb[0].mxu0 %vm413_vm5, %v412_v59 }
 0x294   : > { %v482_v61 = vpop.f32.mrb[0].mxu0 }
 0x295   : > { %v483_v62 = vadd.f32 %v482_v61, %v369_v60  ;;  %v629_v63 = vpop.f32.mrb[1].mxu0 }
 0x297   : > { %486 = vst [vmem:[%s230_s22] sm:$0x1] %v483_v62 }
 0x298   : > { %832 = shalt.err (!%p829_p11)
}
 0x299   : > { %s833_s21 = scalar_lea.hbm %s1195_s26, 16  ;;  %s837_s19 = scalar_lea.hbm %s1247_s3, 32 }
 0x29a   : > { %p834_p0 = scmp.ne.s32.totalorder %s1195_s26, %s833_s21  ;;  %p838_p6 = scmp.lt.u32.totalorder %s1195_s26, %s1247_s3 }
 0x29b   : > { %p839_p7 = scmp.lt.u32.totalorder %s837_s19, %s833_s21  ;;  %p841_p8 = scmp.lt.u32.totalorder %s833_s21, %s1195_s26 }
 0x29c   : > { %p835_p4 = pnand %p834_p0, %p1262_p2 }
 0x29d   : > { %p840_p12 = por %p839_p7, %p838_p6 }
 0x29e   : > { %p836_p13 = pneg %p835_p4 }
 0x29f   : > { %p842_p1 = por %p841_p8, %p840_p12 }
 0x2a1   : > { %p843_p10 = pnand %p842_p1, %p836_p13 }
 0x2a3   : > { %846 = shalt.err (!%p843_p10)
}
 0x2a4   : > { %646 = dma.vmem_to_hbm [thread:$0]  (%p1262_p2), %s1197_s24, 16, %s1195_s26, %s488_s9  }
 0x2a5 PF: > { %s512_s30 = sand.u32 1, %s885_s12   ;;  %p1263_p3 = scmp.ne.s32.totalorder %s1255_s23, 0 }
 0x2a6   : > { %p1264_p5 = scmp.ge.s32.totalorder %s905_s17, 2  ;;  %s513_s20 = scalar_lea.sflag [#allocation6], %s512_s30 }
 0x2a8   : > { %p660_p9 = pnand %p1264_p5, %p1263_p3 }
 0x2aa   : > { %880 = dma.done.wait (!%p660_p9), %s513_s20, 16  }
 0x2ab   : > { %882 = vsyncadd (!%p660_p9), %s513_s20, 4294967280  ;;  %s20_s17 = sadd.s32 1, %s905_s17   ;;  %s1265_s12 = smov %s889_s13 }
 0x2ac   : > { %p17_p11 = scmp.ge.s32.totalorder %s20_s17, 4   ;;  %s1266_s13 = smov %s893_s14 }
 0x2ad   : > { %s1267_s14 = smov %s1082_s4  ;;  %s1268_s15 = smov %s901_s16 }
 0x2ae   : > { %s1269_s16 = smov %s1271_s18  ;;  %19 = sbr.rel (!%p17_p11) target bundleno = 7 (0x7), region = 93 }
 0x2b5   :  { %517 = vsyncpa [#allocation5], 1 }
 0x2b6   :  { %519 = vsyncpa [#allocation5 + $0x1], 1 }
 0x2b7   :  { %520 = vsyncpa [#allocation8], 1 }
 0x2b8   :  { %521 = vsyncpa [#allocation6], 1 }
 0x2b9   :  { %523 = vsyncpa [#allocation6 + $0x1], 1 }

</bundles_post_ra>
